<compile_context>
chip_gen: v6e
topology: v6e:2x2x1
jax: 0.10.0
libtpu: 0.0.40
codegen_flags: <defaults>
</compile_context>

<pallas_src>
import numpy as np
import jax
import jax.numpy as jnp
from jax.experimental import pallas as pl
from jax.experimental.pallas import tpu as pltpu

PRE_SMOOTH = False  # TODO(synk): config.WLML.PRE_SMOOTH not given; False -> "score*score" path

# ----------------------------- model dims ----------------------------------
B = 2          # batch
L = 8          # text length
D_TEXT = 128   # word feature dim
C_VIS = 128    # visual feature dim
H = 128        # hidden dim
V = 128        # text-logit vocab dim
NCPT = 16      # number of episodic concepts
T_VIS = 33     # raw visual length (stride 2 -> 17, stride 1 -> 33)
T_PAD = 40     # T_VIS padded to a sublane multiple (8) so per-batch vis blocks are (40, C)

MASK_W = 128                       # lane-padded mask slab width (lanes 0,1,2 used)
CW = 2 * V + 2 * NCPT + 2          # 290: [wcls2|wcls3|wc2|wc3|wr2|wr3] head width
LANE = 128
SLAB_W = 4 * LANE                  # packed small-output slab: 4 lane groups
OFF_MERGE, OFF_S3, OFF_S2, OFF_CR = 0, 128, 256, 384


def _pad_lanes(x, width):
    """Lane-pad a (1, w) row to (1, width) with zeros (concat, no lax.pad)."""
    return jnp.concatenate(
        [x, jnp.zeros((x.shape[0], width - x.shape[1]), x.dtype)], axis=1)


# ----------------------------- fused kernel ---------------------------------
def _wlml_kernel(text_ref, mask_ref, vis_ref, wt_ref, fw_ref, wbig_ref,
                 bias_ref, const_ref, logits_ref, slab_ref):
    Lk = text_ref.shape[0]              # words per batch row
    H2 = wt_ref.shape[1]                # 2*H (branch-2 lanes 0:H, branch-3 lanes H:2H)
    Hh = H2 // 2
    Tv = const_ref.shape[1]             # 33 real frames
    n2 = 2 * NCPT
    inv_sqrt_h = 1.0 / float(np.sqrt(Hh))

    # ---- consolidated bias slab: one load per row, then vreg slices ---------
    bt_row = bias_ref[0:1, :H2]                     # text-proj bias   (1, 2H)
    fb_row = bias_ref[1:2, :H2]                     # frame-conv bias  (1, 2H)
    row2 = bias_ref[2:3, :]                         # (1, CW)
    wvs_row = row2[:, :H2]                          # video-score weight vectors
    bs2 = row2[:, H2:H2 + 1]                        # video-score biases (1,1)
    bs3 = row2[:, H2 + 1:H2 + 2]
    bias_big = bias_ref[3:4, :]                     # [bcls2|bcls3|bc2|bc3|br2|br3]

    # ---- text path: both branches share one 256-wide matmul ----------------
    tmask = mask_ref[:, 0:1]                        # (L, 1) textual mask
    poolw = mask_ref[:, 1:2]                        # (L, 1) tmask / (sum(tmask)+1e-6)
    wmask = mask_ref[:, 2:3]                        # (L, 1) word_mask * textual_mask
    t = jnp.dot(text_ref[...].astype(jnp.bfloat16), wt_ref[...],
                preferred_element_type=jnp.float32)
    t = jnp.maximum(t + bt_row, 0.0)                # (L, 2H) = [t2 | t3]
    t_m = t * tmask                                 # masked word features
    s_cat = jnp.sum(t * poolw, axis=0, keepdims=True)    # (1, 2H) masked mean pooling
    tw_cat = jnp.sum(t * wmask, axis=0, keepdims=True)   # (1, 2H) word-masked sum

    # ---- word logits + concepts + rewards of BOTH branches: one MXU pass ----
    # (branch features stacked vertically -> dense (128, 290) RHS, no zero blocks)
    big_lhs = jnp.concatenate([t_m[:, :Hh], t_m[:, Hh:],
                               s_cat[:, :Hh], s_cat[:, Hh:],
                               tw_cat[:, :Hh], tw_cat[:, Hh:]], axis=0)   # (2L+4, H)
    big = jnp.dot(big_lhs.astype(jnp.bfloat16), wbig_ref[...],
                  preferred_element_type=jnp.float32) + bias_big          # (2L+4, CW)

    logits_ref[...] = jnp.concatenate([big[:Lk, :V],               # branch-2 logits
                                       big[Lk:2 * Lk, V:2 * V]],   # branch-3 logits
                                      axis=1)                      # (L, 2V)

    heads = jax.nn.sigmoid(big[2 * Lk:, 2 * V:])    # (4, 2*NCPT+2)
    cpt2 = heads[0:1, 0:NCPT]                       # s2 @ wc2 + bc2
    cpt3 = heads[1:2, NCPT:n2]                      # s3 @ wc3 + bc3
    rew2 = heads[2:3, n2:n2 + 1]                    # tw2 @ wr2 + br2
    rew3 = heads[3:4, n2 + 1:n2 + 2]                # tw3 @ wr3 + br3

    # ---- visual path: Conv1d(k=1)+ReLU of BOTH branches, one 256-wide matmul
    vis = jnp.dot(vis_ref[...].astype(jnp.bfloat16), fw_ref[...],
                  preferred_element_type=jnp.float32)
    vis = jnp.maximum(vis + fb_row, 0.0)            # (T_PAD, 2H) = [vis2 | vis3]
    vis_v = vis[:Tv, :]                             # only the 33 real frames

    # per-frame attention / score: one 128-lane half at a time (no (T,2H) products)
    def frame_reduce(lo):
        vh = vis_v[:, lo:lo + Hh][None]                                  # (1, Tv, H)
        att = jax.nn.sigmoid(
            jnp.sum(vh * s_cat[:, None, lo:lo + Hh], axis=-1) * inv_sqrt_h)  # (1, Tv)
        vsc_pre = jnp.sum(vh * wvs_row[:, None, lo:lo + Hh], axis=-1)        # (1, Tv)
        return att, vsc_pre

    att2, vsc2_pre = frame_reduce(0)
    att3, vsc3_pre = frame_reduce(Hh)
    vsc2 = jax.nn.sigmoid(vsc2_pre + bs2)
    vsc3 = jax.nn.sigmoid(vsc3_pre + bs3)
    # conv(k=1) then ::2 subsample == subsample of the full-frame result, so the
    # stride-2 branch score is exactly the even columns of score2_full (wrapper slices).
    score2_full = att2 * vsc2                        # (1, 33)
    score3 = att3 * vsc3                             # (1, 33)

    # ---- np.interp + (savgol | square) + merge as constant matmuls ----------
    interp_m = const_ref[0]                          # row-form interp (folded w/ savgol if PRE_SMOOTH)
    smooth_t = const_ref[1]                          # savgol(9,1,'nearest') matrix, transposed
    s2i = jnp.dot(score2_full, interp_m, preferred_element_type=jnp.float32)
    if PRE_SMOOTH:
        a = s2i                                      # already interp+savgol (folded on host)
        b = jnp.dot(score3, smooth_t, preferred_element_type=jnp.float32)
        merge = jnp.dot(jnp.sqrt(a * b), smooth_t, preferred_element_type=jnp.float32)
    else:
        # sqrt((s2i^2) * (score3^2)) == s2i * score3 exactly (both non-negative).
        merge = jnp.dot(s2i * score3, smooth_t, preferred_element_type=jnp.float32)

    # ---- pack small outputs at 128-aligned lane offsets: ONE unmasked store --
    cptrew = jnp.concatenate([cpt2, cpt3, rew2, rew3], axis=1)      # (1, 34)
    slab_row = jnp.concatenate([_pad_lanes(merge, LANE),
                                _pad_lanes(score3, LANE),
                                _pad_lanes(score2_full, LANE),
                                _pad_lanes(cptrew, LANE)], axis=1)  # (1, 512)
    slab_ref[...] = jnp.broadcast_to(slab_row, slab_ref.shape)      # (8, 512) full store


# ------------------------------ wrapper --------------------------------------
def wlml_forward(textual_input, textual_mask, word_mask, visual_input, packed):
    Bb, Ll, Dt = textual_input.shape
    Tv, Cv = visual_input.shape[1], visual_input.shape[2]
    text_flat = textual_input.reshape(Bb * Ll, Dt)

    # one (B*L, 128) mask slab: lane 0 = textual mask, lane 1 = pooling weight
    # (mask / (sum(mask)+1e-6), i.e. the mean-pool denominator folded in),
    # lane 2 = word mask (already gated by the textual mask).
    denom = jnp.sum(textual_mask, axis=1, keepdims=True) + 1e-6
    mask_cols = jnp.stack([textual_mask,
                           textual_mask / denom,
                           word_mask * textual_mask], axis=-1).reshape(Bb * Ll, 3)
    mask_pack = jnp.pad(mask_cols, ((0, 0), (0, MASK_W - 3)))

    # pad frames to a sublane multiple so each per-batch block is (T_PAD, C);
    # padded rows are discarded in-kernel before any use.
    vis_pad = jnp.pad(visual_input, ((0, 0), (0, T_PAD - Tv), (0, 0)))
    vis_flat = vis_pad.reshape(Bb * T_PAD, Cv)

    wt, fw, wbig = packed["wt"], packed["fw"], packed["wbig"]
    bias_slab, const_mats = packed["bias"], packed["const"]

    def batch2(i): return (i, 0)          # per-batch tiles
    def const2(i): return (0, 0)          # VMEM-resident weights across grid steps
    def const3(i): return (0, 0, 0)

    in_specs = [
        pl.BlockSpec((Ll, Dt), batch2),            # text
        pl.BlockSpec((Ll, MASK_W), batch2),        # mask slab
        pl.BlockSpec((T_PAD, Cv), batch2),         # visual
        pl.BlockSpec(wt.shape, const2),            # text projection (bf16)
        pl.BlockSpec(fw.shape, const2),            # frame conv weights (bf16)
        pl.BlockSpec(wbig.shape, const2),          # classifier+concept+reward (bf16)
        pl.BlockSpec(bias_slab.shape, const2),     # consolidated biases / vectors
        pl.BlockSpec(const_mats.shape, const3),    # interp + savgol matrices
    ]
    out_shapes = (jax.ShapeDtypeStruct((Bb * Ll, 2 * V), jnp.float32),   # [logits2 | logits3]
                  jax.ShapeDtypeStruct((Bb * 8, SLAB_W), jnp.float32))   # packed small outputs
    out_specs = [pl.BlockSpec((Ll, 2 * V), batch2),
                 pl.BlockSpec((8, SLAB_W), batch2)]

    logits_cat, slab = pl.pallas_call(
        _wlml_kernel,
        grid=(Bb,),
        in_specs=in_specs,
        out_specs=out_specs,
        out_shape=out_shapes,
        compiler_params=pltpu.CompilerParams(
            dimension_semantics=("parallel",)),     # both TCs on v7x; DMA/compute overlap
    )(text_flat, mask_pack, vis_flat, wt, fw, wbig, bias_slab, const_mats)

    logits_text_2 = logits_cat[:, :V].reshape(Bb, Ll, V)
    logits_text_3 = logits_cat[:, V:].reshape(Bb, Ll, V)
    slab_b = slab.reshape(Bb, 8, SLAB_W)[:, 0, :]
    merge = jax.lax.stop_gradient(slab_b[:, OFF_MERGE:OFF_MERGE + T_VIS])
    score_3 = slab_b[:, OFF_S3:OFF_S3 + T_VIS]
    score2_full = slab_b[:, OFF_S2:OFF_S2 + T_VIS]
    score_2 = score2_full[:, ::2]                  # exactly the stride-2 branch scores (B, 17)
    cptrew = slab_b[:, OFF_CR:]
    epis_concepts_2 = cptrew[:, :NCPT]
    epis_concepts_3 = cptrew[:, NCPT:2 * NCPT]
    epis_rewards_2 = cptrew[:, 2 * NCPT:2 * NCPT + 1]
    epis_rewards_3 = cptrew[:, 2 * NCPT + 1:2 * NCPT + 2]
    return (merge, logits_text_2, epis_concepts_2, epis_rewards_2, score_2,
            logits_text_3, epis_concepts_3, epis_rewards_3, score_3)


# ---------------------- constant linear maps (host numpy) --------------------
def _interp_matrix_33():
    # np.interp(range(33), range(0, 33, 2), s) expressed on the 33-wide dense
    # score vector (only even input columns are used; odd rows are zero).
    M = np.zeros((T_VIS, T_VIS), np.float32)
    for k in range(17):
        M[2 * k, 2 * k] = 1.0
    for k in range(16):
        M[2 * k, 2 * k + 1] += 0.5
        M[2 * k + 2, 2 * k + 1] += 0.5
    return jnp.asarray(M)


def _savgol_matrix_T():
    # savgol_filter(window=9, polyorder=1, mode='nearest') == 9-tap moving
    # average with edge replication -> constant (33, 33) matrix, passed transposed.
    S = np.zeros((T_VIS, T_VIS), np.float32)
    for i in range(T_VIS):
        for d in range(-4, 5):
            j = min(max(i + d, 0), T_VIS - 1)
            S[i, j] += 1.0 / 9.0
    return jnp.asarray(S.T)


# ------------------------------ parameters ----------------------------------
def _winit(key, shape, scale=0.05):
    return jax.random.normal(key, shape, jnp.float32) * scale


def init_params(key):
    ks = jax.random.split(key, 4)

    def bert(ko):
        kk = jax.random.split(ko, 5)
        return dict(
            wt=_winit(kk[0], (D_TEXT, H)), bt=jnp.zeros((1, H), jnp.float32),
            wcls=_winit(kk[1], (H, V)), bcls=jnp.zeros((1, V), jnp.float32),
            wc=_winit(kk[2], (H, NCPT)), bc=jnp.zeros((1, NCPT), jnp.float32),
            wr=_winit(kk[3], (H, 1)), br=jnp.zeros((1, 1), jnp.float32),
            ws=_winit(kk[4], (1, H)), bs=jnp.zeros((1, 1), jnp.float32),
        )

    return dict(
        frame2_w=_winit(ks[0], (C_VIS, H)), frame2_b=jnp.zeros((1, H), jnp.float32),
        frame3_w=_winit(ks[1], (C_VIS, H)), frame3_b=jnp.zeros((1, H), jnp.float32),
        bert2=bert(ks[2]), bert3=bert(ks[3]),
    )


def pack_params(p):
    """Lay the per-branch weights out for the fused kernel.

    * wt / fw: branch-2 lanes 0:H, branch-3 lanes H:2H (one 256-wide matmul).
    * wbig:   [wcls2 | wcls3 | wc2 | wc3 | wr2 | wr3]  (H, 290), bf16 — dense,
              no zero blocks (branch features are stacked vertically in-kernel).
    * bias:   one (4, 290) f32 slab:
              row0 = [bt2|bt3], row1 = [fb2|fb3],
              row2 = [ws2|ws3|bs2|bs3|0...], row3 = [bcls2|bcls3|bc2|bc3|br2|br3].
    * const:  (2, 33, 33) f32 = [interp (folded w/ savgol if PRE_SMOOTH), savgol^T].
    """
    b2, b3 = p["bert2"], p["bert3"]
    wt = jnp.concatenate([b2["wt"], b3["wt"]], axis=1).astype(jnp.bfloat16)
    fw = jnp.concatenate([p["frame2_w"], p["frame3_w"]], axis=1).astype(jnp.bfloat16)
    wbig = jnp.concatenate([b2["wcls"], b3["wcls"], b2["wc"], b3["wc"],
                            b2["wr"], b3["wr"]], axis=1).astype(jnp.bfloat16)

    bias = jnp.zeros((4, CW), jnp.float32)
    bias = bias.at[0, :2 * H].set(
        jnp.concatenate([b2["bt"], b3["bt"]], axis=1)[0])
    bias = bias.at[1, :2 * H].set(
        jnp.concatenate([p["frame2_b"], p["frame3_b"]], axis=1)[0])
    bias = bias.at[2, :2 * H].set(
        jnp.concatenate([b2["ws"], b3["ws"]], axis=1)[0])
    bias = bias.at[2, 2 * H].set(b2["bs"][0, 0])
    bias = bias.at[2, 2 * H + 1].set(b3["bs"][0, 0])
    bias = bias.at[3, :].set(
        jnp.concatenate([b2["bcls"], b3["bcls"], b2["bc"], b3["bc"],
                         b2["br"], b3["br"]], axis=1)[0])

    interp_m = _interp_matrix_33()
    smooth_t = _savgol_matrix_T()
    plane0 = interp_m @ smooth_t if PRE_SMOOTH else interp_m   # fold savgol into interp
    const = jnp.stack([plane0, smooth_t], axis=0)

    return dict(wt=wt, fw=fw, wbig=wbig, bias=bias, const=const)


# --------------------------------- main --------------------------------------
if __name__ == "__main__":
    key = jax.random.PRNGKey(0)
    k_text, k_vis, k_par = jax.random.split(key, 3)

    textual_input = jax.random.normal(k_text, (B, L, D_TEXT), jnp.float32)
    lengths = jnp.array([L, 5])
    textual_mask = (jnp.arange(L)[None, :] < lengths[:, None]).astype(jnp.float32)   # (B, L)
    word_mask = jnp.zeros((B, L), jnp.float32).at[:, jnp.array([1, 3])].set(1.0) * textual_mask
    visual_input = jax.random.normal(k_vis, (B, T_VIS, C_VIS), jnp.float32)

    params = init_params(k_par)
    packed = pack_params(params)

    fwd = jax.jit(wlml_forward)
    outs = jax.block_until_ready(fwd(textual_input, textual_mask, word_mask,
                                     visual_input, packed))

    (merge, lg2, cpt2, rw2, score_2, lg3, cpt3, rw3, score_3) = outs
    assert merge.shape == (B, T_VIS) and score_2.shape == (B, 17) and score_3.shape == (B, T_VIS)
    assert lg2.shape == (B, L, V) and lg3.shape == (B, L, V)
    assert cpt2.shape == (B, NCPT) and cpt3.shape == (B, NCPT)
    assert rw2.shape == (B, 1) and rw3.shape == (B, 1)
    assert all(bool(jnp.all(jnp.isfinite(o))) for o in outs)
    print("KERNEL_OK")
</pallas_src>

<mosaic_0001>
module attributes {stable_mosaic.version = 11 : i64} {
  func.func @_wlml_kernel(%arg0: i32, %arg1: memref<8x128xf32, #tpu.memory_space<vmem>>, %arg2: memref<8x128xf32, #tpu.memory_space<vmem>>, %arg3: memref<40x128xf32, #tpu.memory_space<vmem>>, %arg4: memref<128x256xbf16, #tpu.memory_space<vmem>>, %arg5: memref<128x256xbf16, #tpu.memory_space<vmem>>, %arg6: memref<128x290xbf16, #tpu.memory_space<vmem>>, %arg7: memref<4x290xf32, #tpu.memory_space<vmem>>, %arg8: memref<2x33x33xf32, #tpu.memory_space<vmem>>, %arg9: memref<8x256xf32, #tpu.memory_space<vmem>>, %arg10: memref<8x512xf32, #tpu.memory_space<vmem>>) attributes {dimension_semantics = [#tpu.dimension_semantics<parallel>], iteration_bounds = array<i64: 2>, scalar_prefetch = 0 : i64, scratch_operands = 0 : i64, tpu.core_type = #tpu.core_type<tc>, window_params = [{transform_indices = @transform_0, window_bounds = array<i64: 8, 128>}, {transform_indices = @transform_1, window_bounds = array<i64: 8, 128>}, {transform_indices = @transform_2, window_bounds = array<i64: 40, 128>}, {pipeline_mode = #tpu.pipeline_mode<synchronous>, transform_indices = @transform_3, window_bounds = array<i64: 128, 256>}, {pipeline_mode = #tpu.pipeline_mode<synchronous>, transform_indices = @transform_4, window_bounds = array<i64: 128, 256>}, {pipeline_mode = #tpu.pipeline_mode<synchronous>, transform_indices = @transform_5, window_bounds = array<i64: 128, 290>}, {pipeline_mode = #tpu.pipeline_mode<synchronous>, transform_indices = @transform_6, window_bounds = array<i64: 4, 290>}, {pipeline_mode = #tpu.pipeline_mode<synchronous>, transform_indices = @transform_7, window_bounds = array<i64: 2, 33, 33>}, {transform_indices = @transform_8, window_bounds = array<i64: 8, 256>}, {transform_indices = @transform_9, window_bounds = array<i64: 8, 512>}]} {
    %c0 = arith.constant 0 : index
    %c0_0 = arith.constant 0 : index
    %0 = vector.load %arg7[%c0, %c0_0] : memref<4x290xf32, #tpu.memory_space<vmem>>, vector<1x256xf32>
    %c1 = arith.constant 1 : index
    %c0_1 = arith.constant 0 : index
    %1 = vector.load %arg7[%c1, %c0_1] : memref<4x290xf32, #tpu.memory_space<vmem>>, vector<1x256xf32>
    %c2 = arith.constant 2 : index
    %c0_2 = arith.constant 0 : index
    %2 = vector.load %arg7[%c2, %c0_2] : memref<4x290xf32, #tpu.memory_space<vmem>>, vector<1x290xf32>
    %3 = vector.extract_strided_slice %2 {offsets = [0, 0], sizes = [1, 256], strides = [1, 1]} : vector<1x290xf32> to vector<1x256xf32>
    %4 = vector.extract_strided_slice %2 {offsets = [0, 256], sizes = [1, 1], strides = [1, 1]} : vector<1x290xf32> to vector<1x1xf32>
    %5 = vector.extract_strided_slice %2 {offsets = [0, 257], sizes = [1, 1], strides = [1, 1]} : vector<1x290xf32> to vector<1x1xf32>
    %c3 = arith.constant 3 : index
    %c0_3 = arith.constant 0 : index
    %6 = vector.load %arg7[%c3, %c0_3] : memref<4x290xf32, #tpu.memory_space<vmem>>, vector<1x290xf32>
    %c0_4 = arith.constant 0 : index
    %c0_5 = arith.constant 0 : index
    %7 = vector.load %arg2[%c0_4, %c0_5] : memref<8x128xf32, #tpu.memory_space<vmem>>, vector<8x1xf32>
    %c0_6 = arith.constant 0 : index
    %c1_7 = arith.constant 1 : index
    %8 = vector.load %arg2[%c0_6, %c1_7] : memref<8x128xf32, #tpu.memory_space<vmem>>, vector<8x1xf32>
    %c0_8 = arith.constant 0 : index
    %c2_9 = arith.constant 2 : index
    %9 = vector.load %arg2[%c0_8, %c2_9] : memref<8x128xf32, #tpu.memory_space<vmem>>, vector<8x1xf32>
    %c0_10 = arith.constant 0 : index
    %c0_11 = arith.constant 0 : index
    %10 = vector.load %arg1[%c0_10, %c0_11] : memref<8x128xf32, #tpu.memory_space<vmem>>, vector<8x128xf32>
    %11 = arith.truncf %10 : vector<8x128xf32> to vector<8x128xbf16>
    %c0_12 = arith.constant 0 : index
    %c0_13 = arith.constant 0 : index
    %12 = vector.load %arg4[%c0_12, %c0_13] : memref<128x256xbf16, #tpu.memory_space<vmem>>, vector<128x256xbf16>
    %cst = arith.constant dense<0.000000e+00> : vector<8x256xf32>
    %13 = tpu.matmul %11, %12, %cst {dimension_numbers = #tpu.dot_dimension_numbers<[1], [0], [0], [1], [0, 0, 1, 1], [], []>} : vector<8x128xbf16>, vector<128x256xbf16>, vector<8x256xf32> -> vector<8x256xf32>
    %14 = vector.broadcast %0 : vector<1x256xf32> to vector<8x256xf32>
    %15 = arith.addf %13, %14 : vector<8x256xf32>
    %cst_14 = arith.constant 0.000000e+00 : f32
    %16 = vector.broadcast %cst_14 : f32 to vector<8x256xf32>
    %17 = arith.maximumf %15, %16 : vector<8x256xf32>
    %18 = vector.broadcast %7 : vector<8x1xf32> to vector<8x256xf32>
    %19 = arith.mulf %17, %18 : vector<8x256xf32>
    %20 = vector.broadcast %8 : vector<8x1xf32> to vector<8x256xf32>
    %21 = arith.mulf %17, %20 : vector<8x256xf32>
    %cst_15 = arith.constant dense<0.000000e+00> : vector<256xf32>
    %22 = vector.multi_reduction <add>, %21, %cst_15 [0] : vector<8x256xf32> to vector<256xf32>
    %23 = vector.shape_cast %22 : vector<256xf32> to vector<1x256xf32>
    %24 = vector.broadcast %9 : vector<8x1xf32> to vector<8x256xf32>
    %25 = arith.mulf %17, %24 : vector<8x256xf32>
    %cst_16 = arith.constant dense<0.000000e+00> : vector<256xf32>
    %26 = vector.multi_reduction <add>, %25, %cst_16 [0] : vector<8x256xf32> to vector<256xf32>
    %27 = vector.shape_cast %26 : vector<256xf32> to vector<1x256xf32>
    %28 = vector.extract_strided_slice %19 {offsets = [0, 0], sizes = [8, 128], strides = [1, 1]} : vector<8x256xf32> to vector<8x128xf32>
    %29 = vector.extract_strided_slice %19 {offsets = [0, 128], sizes = [8, 128], strides = [1, 1]} : vector<8x256xf32> to vector<8x128xf32>
    %30 = vector.extract_strided_slice %23 {offsets = [0, 0], sizes = [1, 128], strides = [1, 1]} : vector<1x256xf32> to vector<1x128xf32>
    %31 = vector.extract_strided_slice %23 {offsets = [0, 128], sizes = [1, 128], strides = [1, 1]} : vector<1x256xf32> to vector<1x128xf32>
    %32 = vector.extract_strided_slice %27 {offsets = [0, 0], sizes = [1, 128], strides = [1, 1]} : vector<1x256xf32> to vector<1x128xf32>
    %33 = vector.extract_strided_slice %27 {offsets = [0, 128], sizes = [1, 128], strides = [1, 1]} : vector<1x256xf32> to vector<1x128xf32>
    %34 = tpu.concatenate %28, %29, %30, %31, %32, %33 in 0 : vector<8x128xf32>, vector<8x128xf32>, vector<1x128xf32>, vector<1x128xf32>, vector<1x128xf32>, vector<1x128xf32> -> vector<20x128xf32>
    %35 = arith.truncf %34 : vector<20x128xf32> to vector<20x128xbf16>
    %c0_17 = arith.constant 0 : index
    %c0_18 = arith.constant 0 : index
    %36 = vector.load %arg6[%c0_17, %c0_18] : memref<128x290xbf16, #tpu.memory_space<vmem>>, vector<128x290xbf16>
    %cst_19 = arith.constant dense<0.000000e+00> : vector<20x290xf32>
    %37 = tpu.matmul %35, %36, %cst_19 {dimension_numbers = #tpu.dot_dimension_numbers<[1], [0], [0], [1], [0, 0, 1, 1], [], []>} : vector<20x128xbf16>, vector<128x290xbf16>, vector<20x290xf32> -> vector<20x290xf32>
    %38 = vector.broadcast %6 : vector<1x290xf32> to vector<20x290xf32>
    %39 = arith.addf %37, %38 : vector<20x290xf32>
    %40 = vector.extract_strided_slice %39 {offsets = [0, 0], sizes = [8, 128], strides = [1, 1]} : vector<20x290xf32> to vector<8x128xf32>
    %41 = vector.extract_strided_slice %39 {offsets = [8, 128], sizes = [8, 128], strides = [1, 1]} : vector<20x290xf32> to vector<8x128xf32>
    %42 = tpu.concatenate %40, %41 in 1 : vector<8x128xf32>, vector<8x128xf32> -> vector<8x256xf32>
    %c0_20 = arith.constant 0 : index
    %c0_21 = arith.constant 0 : index
    %43 = vector.load %arg9[%c0_20, %c0_21] : memref<8x256xf32, #tpu.memory_space<vmem>>, vector<8x256xf32>
    tpu.vector_store %arg9[%c0_20, %c0_21], %42 {strides = array<i32>} : memref<8x256xf32, #tpu.memory_space<vmem>>, vector<8x256xf32>,
    %44 = vector.extract_strided_slice %39 {offsets = [16, 256], sizes = [4, 34], strides = [1, 1]} : vector<20x290xf32> to vector<4x34xf32>
    %45 = arith.negf %44 : vector<4x34xf32>
    %46 = math.exp %45 : vector<4x34xf32>
    %cst_22 = arith.constant 1.000000e+00 : f32
    %47 = vector.broadcast %cst_22 : f32 to vector<4x34xf32>
    %48 = arith.addf %47, %46 : vector<4x34xf32>
    %49 = arith.divf %47, %48 : vector<4x34xf32>
    %50 = vector.extract_strided_slice %49 {offsets = [0, 0], sizes = [1, 16], strides = [1, 1]} : vector<4x34xf32> to vector<1x16xf32>
    %51 = vector.extract_strided_slice %49 {offsets = [1, 16], sizes = [1, 16], strides = [1, 1]} : vector<4x34xf32> to vector<1x16xf32>
    %52 = vector.extract_strided_slice %49 {offsets = [2, 32], sizes = [1, 1], strides = [1, 1]} : vector<4x34xf32> to vector<1x1xf32>
    %53 = vector.extract_strided_slice %49 {offsets = [3, 33], sizes = [1, 1], strides = [1, 1]} : vector<4x34xf32> to vector<1x1xf32>
    %c0_23 = arith.constant 0 : index
    %c0_24 = arith.constant 0 : index
    %54 = vector.load %arg3[%c0_23, %c0_24] : memref<40x128xf32, #tpu.memory_space<vmem>>, vector<40x128xf32>
    %55 = arith.truncf %54 : vector<40x128xf32> to vector<40x128xbf16>
    %c0_25 = arith.constant 0 : index
    %c0_26 = arith.constant 0 : index
    %56 = vector.load %arg5[%c0_25, %c0_26] : memref<128x256xbf16, #tpu.memory_space<vmem>>, vector<128x256xbf16>
    %cst_27 = arith.constant dense<0.000000e+00> : vector<40x256xf32>
    %57 = tpu.matmul %55, %56, %cst_27 {dimension_numbers = #tpu.dot_dimension_numbers<[1], [0], [0], [1], [0, 0, 1, 1], [], []>} : vector<40x128xbf16>, vector<128x256xbf16>, vector<40x256xf32> -> vector<40x256xf32>
    %58 = vector.broadcast %1 : vector<1x256xf32> to vector<40x256xf32>
    %59 = arith.addf %57, %58 : vector<40x256xf32>
    %cst_28 = arith.constant 0.000000e+00 : f32
    %60 = vector.broadcast %cst_28 : f32 to vector<40x256xf32>
    %61 = arith.maximumf %59, %60 : vector<40x256xf32>
    %62 = vector.extract_strided_slice %61 {offsets = [0, 0], sizes = [33, 256], strides = [1, 1]} : vector<40x256xf32> to vector<33x256xf32>
    %63 = vector.extract_strided_slice %62 {offsets = [0, 0], sizes = [33, 128], strides = [1, 1]} : vector<33x256xf32> to vector<33x128xf32>
    %64 = vector.shape_cast %63 : vector<33x128xf32> to vector<1x33x128xf32>
    %65 = vector.extract_strided_slice %23 {offsets = [0, 0], sizes = [1, 128], strides = [1, 1]} : vector<1x256xf32> to vector<1x128xf32>
    %66 = vector.shape_cast %65 : vector<1x128xf32> to vector<1x1x128xf32>
    %67 = vector.broadcast %66 : vector<1x1x128xf32> to vector<1x33x128xf32>
    %68 = arith.mulf %64, %67 : vector<1x33x128xf32>
    %cst_29 = arith.constant dense<0.000000e+00> : vector<1x33xf32>
    %69 = vector.multi_reduction <add>, %68, %cst_29 [2] : vector<1x33x128xf32> to vector<1x33xf32>
    %cst_30 = arith.constant 0.0883883461 : f32
    %70 = vector.broadcast %cst_30 : f32 to vector<1x33xf32>
    %71 = arith.mulf %69, %70 : vector<1x33xf32>
    %72 = arith.negf %71 : vector<1x33xf32>
    %73 = math.exp %72 : vector<1x33xf32>
    %cst_31 = arith.constant 1.000000e+00 : f32
    %74 = vector.broadcast %cst_31 : f32 to vector<1x33xf32>
    %75 = arith.addf %74, %73 : vector<1x33xf32>
    %76 = arith.divf %74, %75 : vector<1x33xf32>
    %77 = vector.extract_strided_slice %3 {offsets = [0, 0], sizes = [1, 128], strides = [1, 1]} : vector<1x256xf32> to vector<1x128xf32>
    %78 = vector.shape_cast %77 : vector<1x128xf32> to vector<1x1x128xf32>
    %79 = vector.broadcast %78 : vector<1x1x128xf32> to vector<1x33x128xf32>
    %80 = arith.mulf %64, %79 : vector<1x33x128xf32>
    %cst_32 = arith.constant dense<0.000000e+00> : vector<1x33xf32>
    %81 = vector.multi_reduction <add>, %80, %cst_32 [2] : vector<1x33x128xf32> to vector<1x33xf32>
    %82 = vector.extract_strided_slice %62 {offsets = [0, 128], sizes = [33, 128], strides = [1, 1]} : vector<33x256xf32> to vector<33x128xf32>
    %83 = vector.shape_cast %82 : vector<33x128xf32> to vector<1x33x128xf32>
    %84 = vector.extract_strided_slice %23 {offsets = [0, 128], sizes = [1, 128], strides = [1, 1]} : vector<1x256xf32> to vector<1x128xf32>
    %85 = vector.shape_cast %84 : vector<1x128xf32> to vector<1x1x128xf32>
    %86 = vector.broadcast %85 : vector<1x1x128xf32> to vector<1x33x128xf32>
    %87 = arith.mulf %83, %86 : vector<1x33x128xf32>
    %cst_33 = arith.constant dense<0.000000e+00> : vector<1x33xf32>
    %88 = vector.multi_reduction <add>, %87, %cst_33 [2] : vector<1x33x128xf32> to vector<1x33xf32>
    %cst_34 = arith.constant 0.0883883461 : f32
    %89 = vector.broadcast %cst_34 : f32 to vector<1x33xf32>
    %90 = arith.mulf %88, %89 : vector<1x33xf32>
    %91 = arith.negf %90 : vector<1x33xf32>
    %92 = math.exp %91 : vector<1x33xf32>
    %cst_35 = arith.constant 1.000000e+00 : f32
    %93 = vector.broadcast %cst_35 : f32 to vector<1x33xf32>
    %94 = arith.addf %93, %92 : vector<1x33xf32>
    %95 = arith.divf %93, %94 : vector<1x33xf32>
    %96 = vector.extract_strided_slice %3 {offsets = [0, 128], sizes = [1, 128], strides = [1, 1]} : vector<1x256xf32> to vector<1x128xf32>
    %97 = vector.shape_cast %96 : vector<1x128xf32> to vector<1x1x128xf32>
    %98 = vector.broadcast %97 : vector<1x1x128xf32> to vector<1x33x128xf32>
    %99 = arith.mulf %83, %98 : vector<1x33x128xf32>
    %cst_36 = arith.constant dense<0.000000e+00> : vector<1x33xf32>
    %100 = vector.multi_reduction <add>, %99, %cst_36 [2] : vector<1x33x128xf32> to vector<1x33xf32>
    %101 = vector.broadcast %4 : vector<1x1xf32> to vector<1x33xf32>
    %102 = arith.addf %81, %101 : vector<1x33xf32>
    %103 = arith.negf %102 : vector<1x33xf32>
    %104 = math.exp %103 : vector<1x33xf32>
    %cst_37 = arith.constant 1.000000e+00 : f32
    %105 = vector.broadcast %cst_37 : f32 to vector<1x33xf32>
    %106 = arith.addf %105, %104 : vector<1x33xf32>
    %107 = arith.divf %105, %106 : vector<1x33xf32>
    %108 = vector.broadcast %5 : vector<1x1xf32> to vector<1x33xf32>
    %109 = arith.addf %100, %108 : vector<1x33xf32>
    %110 = arith.negf %109 : vector<1x33xf32>
    %111 = math.exp %110 : vector<1x33xf32>
    %cst_38 = arith.constant 1.000000e+00 : f32
    %112 = vector.broadcast %cst_38 : f32 to vector<1x33xf32>
    %113 = arith.addf %112, %111 : vector<1x33xf32>
    %114 = arith.divf %112, %113 : vector<1x33xf32>
    %115 = arith.mulf %76, %107 : vector<1x33xf32>
    %116 = arith.mulf %95, %114 : vector<1x33xf32>
    %c0_39 = arith.constant 0 : index
    %c0_40 = arith.constant 0 : index
    %c0_41 = arith.constant 0 : index
    %117 = vector.load %arg8[%c0_39, %c0_40, %c0_41] : memref<2x33x33xf32, #tpu.memory_space<vmem>>, vector<1x33x33xf32>
    %118 = vector.shape_cast %117 : vector<1x33x33xf32> to vector<33x33xf32>
    %c1_42 = arith.constant 1 : index
    %c0_43 = arith.constant 0 : index
    %c0_44 = arith.constant 0 : index
    %119 = vector.load %arg8[%c1_42, %c0_43, %c0_44] : memref<2x33x33xf32, #tpu.memory_space<vmem>>, vector<1x33x33xf32>
    %120 = vector.shape_cast %119 : vector<1x33x33xf32> to vector<33x33xf32>
    %cst_45 = arith.constant dense<0.000000e+00> : vector<1x33xf32>
    %121 = tpu.matmul %115, %118, %cst_45 {dimension_numbers = #tpu.dot_dimension_numbers<[1], [0], [0], [1], [0, 0, 1, 1], [], []>} : vector<1x33xf32>, vector<33x33xf32>, vector<1x33xf32> -> vector<1x33xf32>
    %122 = arith.mulf %121, %116 : vector<1x33xf32>
    %cst_46 = arith.constant dense<0.000000e+00> : vector<1x33xf32>
    %123 = tpu.matmul %122, %120, %cst_46 {dimension_numbers = #tpu.dot_dimension_numbers<[1], [0], [0], [1], [0, 0, 1, 1], [], []>} : vector<1x33xf32>, vector<33x33xf32>, vector<1x33xf32> -> vector<1x33xf32>
    %124 = tpu.concatenate %50, %51, %52, %53 in 1 : vector<1x16xf32>, vector<1x16xf32>, vector<1x1xf32>, vector<1x1xf32> -> vector<1x34xf32>
    %cst_47 = arith.constant 0.000000e+00 : f32
    %125 = vector.broadcast %cst_47 : f32 to vector<1x95xf32>
    %126 = tpu.concatenate %123, %125 in 1 : vector<1x33xf32>, vector<1x95xf32> -> vector<1x128xf32>
    %cst_48 = arith.constant 0.000000e+00 : f32
    %127 = vector.broadcast %cst_48 : f32 to vector<1x95xf32>
    %128 = tpu.concatenate %116, %127 in 1 : vector<1x33xf32>, vector<1x95xf32> -> vector<1x128xf32>
    %cst_49 = arith.constant 0.000000e+00 : f32
    %129 = vector.broadcast %cst_49 : f32 to vector<1x95xf32>
    %130 = tpu.concatenate %115, %129 in 1 : vector<1x33xf32>, vector<1x95xf32> -> vector<1x128xf32>
    %cst_50 = arith.constant 0.000000e+00 : f32
    %131 = vector.broadcast %cst_50 : f32 to vector<1x94xf32>
    %132 = tpu.concatenate %124, %131 in 1 : vector<1x34xf32>, vector<1x94xf32> -> vector<1x128xf32>
    %133 = tpu.concatenate %126, %128, %130, %132 in 1 : vector<1x128xf32>, vector<1x128xf32>, vector<1x128xf32>, vector<1x128xf32> -> vector<1x512xf32>
    %134 = vector.shape_cast %133 : vector<1x512xf32> to vector<1x512xf32>
    %135 = vector.broadcast %134 : vector<1x512xf32> to vector<8x512xf32>
    %c0_51 = arith.constant 0 : index
    %c0_52 = arith.constant 0 : index
    %136 = vector.load %arg10[%c0_51, %c0_52] : memref<8x512xf32, #tpu.memory_space<vmem>>, vector<8x512xf32>
    tpu.vector_store %arg10[%c0_51, %c0_52], %135 {strides = array<i32>} : memref<8x512xf32, #tpu.memory_space<vmem>>, vector<8x512xf32>,
    return
  }
  func.func @transform_0(%arg0: i32) -> (i32, i32) {
    %c0_i32 = arith.constant 0 : i32
    %c0_i32_0 = arith.constant 0 : i32
    return %arg0, %c0_i32 : i32, i32
  }
  func.func @transform_1(%arg0: i32) -> (i32, i32) {
    %c0_i32 = arith.constant 0 : i32
    %c0_i32_0 = arith.constant 0 : i32
    return %arg0, %c0_i32 : i32, i32
  }
  func.func @transform_2(%arg0: i32) -> (i32, i32) {
    %c0_i32 = arith.constant 0 : i32
    %c0_i32_0 = arith.constant 0 : i32
    return %arg0, %c0_i32 : i32, i32
  }
  func.func @transform_3(%arg0: i32) -> (i32, i32) {
    %c0_i32 = arith.constant 0 : i32
    %c0_i32_0 = arith.constant 0 : i32
    %c0_i32_1 = arith.constant 0 : i32
    return %c0_i32, %c0_i32_0 : i32, i32
  }
  func.func @transform_4(%arg0: i32) -> (i32, i32) {
    %c0_i32 = arith.constant 0 : i32
    %c0_i32_0 = arith.constant 0 : i32
    %c0_i32_1 = arith.constant 0 : i32
    return %c0_i32, %c0_i32_0 : i32, i32
  }
  func.func @transform_5(%arg0: i32) -> (i32, i32) {
    %c0_i32 = arith.constant 0 : i32
    %c0_i32_0 = arith.constant 0 : i32
    %c0_i32_1 = arith.constant 0 : i32
    return %c0_i32, %c0_i32_0 : i32, i32
  }
  func.func @transform_6(%arg0: i32) -> (i32, i32) {
    %c0_i32 = arith.constant 0 : i32
    %c0_i32_0 = arith.constant 0 : i32
    %c0_i32_1 = arith.constant 0 : i32
    return %c0_i32, %c0_i32_0 : i32, i32
  }
  func.func @transform_7(%arg0: i32) -> (i32, i32, i32) {
    %c0_i32 = arith.constant 0 : i32
    %c0_i32_0 = arith.constant 0 : i32
    %c0_i32_1 = arith.constant 0 : i32
    %c0_i32_2 = arith.constant 0 : i32
    return %c0_i32, %c0_i32_0, %c0_i32_1 : i32, i32, i32
  }
  func.func @transform_8(%arg0: i32) -> (i32, i32) {
    %c0_i32 = arith.constant 0 : i32
    %c0_i32_0 = arith.constant 0 : i32
    return %arg0, %c0_i32 : i32, i32
  }
  func.func @transform_9(%arg0: i32) -> (i32, i32) {
    %c0_i32 = arith.constant 0 : i32
    %c0_i32_0 = arith.constant 0 : i32
    return %arg0, %c0_i32 : i32, i32
  }
}

</mosaic_0001>

<bundles_post_ra>
// kernel: wlml_forward.1
= control target key start
LH: loop header
LB: loop body
LE: loop exit
PB: predicated region body
PF: predicated region fallthrough
CT: control target
= control target key end

     0   :  { %s2099_s30 = smov 0   ;;  %s2482_s0 = inlined_call_operand.vmem [shape: f32[16,128], index: 0, kind: input, shape index: {}]   ;;  %s2483_s1 = inlined_call_operand.vmem [shape: f32[16,128], index: 1, kind: input, shape index: {}]   ;;  %s2484_s2 = inlined_call_operand.vmem [shape: f32[80,128], index: 2, kind: input, shape index: {}]   ;;  %s2485_s3 = inlined_call_operand.vmem [shape: bf16[128,256], index: 3, kind: input, shape index: {}]   ;;  %s2486_s4 = inlined_call_operand.vmem [shape: bf16[128,256], index: 4, kind: input, shape index: {}]   ;;  %s2487_s5 = inlined_call_operand.vmem [shape: bf16[128,290], index: 5, kind: input, shape index: {}]   ;;  %s2488_s6 = inlined_call_operand.vmem [shape: f32[4,290], index: 6, kind: input, shape index: {}]   ;;  %s2489_s7 = inlined_call_operand.vmem [shape: f32[2,33,33], index: 7, kind: input, shape index: {}]   ;;  %s2490_s8 = inlined_call_operand.vmem [shape: f32[16,256], index: 8, kind: output, shape index: {0}]   ;;  %s2491_s9 = inlined_call_operand.vmem [shape: f32[16,512], index: 9, kind: output, shape index: {1}]  }
   0x1 LB: > { %s2105_s10 = sadd.s32 4294967295, %s2042_s30   ;;  %p1686_p0 = scmp.ge.s32.totalorder %s2042_s30, 1  ;;  %s2042_s30 = sphi %s2099_s30, %s20_s30  }
   0x2   : > { %p309_p1 = scmp.lt.s32.totalorder %s2042_s30, 3 }
   0x4   : > { %p310_p2 = pnand %p1686_p0, %p309_p1 }
   0x5   : > { %p358_p3 = scmp.lt.s32.totalorder (!%p310_p2), %s2105_s10, 1  ;;  %s366_s27 = smul.u32 (!%p310_p2), 5, %s2105_s10 }
   0x6   : > { %313 = sbr.rel (%p310_p2) target bundleno = 1077 (0x435), region = 52 }
   0x7   : > { %p367_p4 = scmp.lt.s32.totalorder (!%p310_p2), %s366_s27, 9 }
   0xb   : > { %v1872_v0 = vld [vmem:[%s2485_s3 + $0x74] ss:$8 sps:$4 sm:$0xff]   ;;  %v1874_v1 = vld [vmem:[%s2485_s3 + $0x70] ss:$8 sps:$4 sm:$0xff]   ;;  %v2044_v2 = vmov 0   ;;  %v2045_v4 = vmov 2   ;;  %v410_v47 = vlaneseq }
   0xc   : > { %532 = vmatprep.mubr.bf16.mxu0 %v2044_v2  ;;  %1868 = vset.pattern.permute.xlu0 %v2044_v2  ;;  %v1875_v3 = vld [vmem:[%s2485_s3 + $0x64] ss:$8 sps:$4 sm:$0xff]   ;;  %v1877_v5 = vld [vmem:[%s2485_s3 + $0x60] ss:$8 sps:$4 sm:$0xff]   ;;  %s2125_s19 = scalar_select %p358_p3, %s2105_s10, 1  ;;  %v2046_v18 = vmov 1  }
   0xd   : > { %500 = vmatprep.subr.bf16.mxu0 %v1872_v0  ;;  %1870 = vset.pattern.permute.xlu1 %v2045_v4  ;;  %v1878_v6 = vld [vmem:[%s2485_s3 + $0x54] ss:$8 sps:$4 sm:$0xff]   ;;  %v1880_v7 = vld [vmem:[%s2485_s3 + $0x50] ss:$8 sps:$4 sm:$0xff]   ;;  %v1881_v8 = vld [vmem:[%s2485_s3 + $0x44] ss:$8 sps:$4 sm:$0xff]  }
   0xe   : > { %501 = vmatpush1.bf16.msra.mxu0 %v1874_v1  ;;  %802 = vmatprep.mubr.bf16.mxu1 %v2044_v2  ;;  %s1687_s24 = sshll.u32 %s2125_s19, 3  ;;  %v1883_v9 = vld [vmem:[%s2485_s3 + $0x40] ss:$8 sps:$4 sm:$0xff]   ;;  %v1884_v10 = vld [vmem:[%s2485_s3 + $0x34] ss:$8 sps:$4 sm:$0xff]   ;;  %v2252_v48 = vshrl.u32 %v410_v47, 7 }
   0xf   : > { %502 = vmatprep.subr.bf16.mxu0 %v1875_v3  ;;  %s365_s29 = scalar_lea.vmem %s2483_s1, %s1687_s24  ;;  %v1896_v12 = vld [vmem:[%s2487_s5 + $0xac] ss:$12 sps:$4 sm:$0xff]   ;;  %v1898_v13 = vld [vmem:[%s2487_s5 + $0xa8] ss:$12 sps:$4 sm:$0xff]   ;;  %v1901_v16 = vld [vmem:[%s2487_s5 + $0x90] ss:$12 sps:$4 sm:$0xff]   ;;  %s361_s11 = scalar_lea.vmem %s2482_s0, %s1687_s24 }
  0x10   : > { %v390_v11 = vld [vmem:[%s365_s29] sm:$0xff]  ;;  %v1886_v15 = vld [vmem:[%s2485_s3 + $0x30] ss:$8 sps:$4 sm:$0xff]   ;;  %770 = vmatprep.subr.bf16.mxu1 %v1896_v12  ;;  %v1902_v19 = vld [vmem:[%s2487_s5 + $0x7c] ss:$12 sps:$4 sm:$0xff]   ;;  %v2255_v49 = vsub.s32 0, %v2252_v48 }
  0x11   : > { %545 = vperm.xlu0 %1868, %v390_v11   ;;  %569 = vperm.xlu1 %1870, %v390_v11   ;;  %v1899_v14 = vld [vmem:[%s2487_s5 + $0x94] ss:$12 sps:$4 sm:$0xff]   ;;  %v1887_v17 = vld [vmem:[%s2485_s3 + $0x24] ss:$8 sps:$4 sm:$0xff]   ;;  %v1892_v24 = vld [vmem:[%s2485_s3 + $0x10] ss:$8 sps:$4 sm:$0xff]  }
  0x12   : > { %503 = vmatpush1.bf16.msra.mxu0 %v1877_v5  ;;  %771 = vmatpush1.bf16.msra.mxu1 %v1898_v13  ;;  %v1889_v20 = vld [vmem:[%s2485_s3 + $0x20] ss:$8 sps:$4 sm:$0xff]   ;;  %v1890_v21 = vld [vmem:[%s2485_s3 + $0x14] ss:$8 sps:$4 sm:$0xff]   ;;  %v1904_v22 = vld [vmem:[%s2487_s5 + $0x78] ss:$12 sps:$4 sm:$0xff]  }
  0x13   : > { %504 = vmatprep.subr.bf16.mxu0 %v1878_v6  ;;  %772 = vmatprep.subr.bf16.mxu1 %v1899_v14  ;;  %v1905_v23 = vld [vmem:[%s2487_s5 + $0x64] ss:$12 sps:$4 sm:$0xff]   ;;  %v1907_v25 = vld [vmem:[%s2487_s5 + $0x60] ss:$12 sps:$4 sm:$0xff]   ;;  %v1911_v30 = vld [vmem:[%s2487_s5 + $0x48] ss:$12 sps:$4 sm:$0xff]  }
  0x14   : > { %v1893_v26 = vld [vmem:[%s2485_s3 + $0x4] ss:$8 sps:$4 sm:$0xff]   ;;  %v1895_v28 = vld [vmem:[%s2485_s3] ss:$8 sps:$4 sm:$0xff]   ;;  %v1910_v31 = vld [vmem:[%s2487_s5 + $0xb0] ss:$12 sps:$4 sm:$0xff]  }
  0x15   : > { %1869 = vset.pattern.permute.xlu0 %v2046_v18  ;;  %1871 = vset.pattern.permute.xlu1 %v2044_v2  ;;  %v1908_v27 = vld [vmem:[%s2487_s5 + $0x4c] ss:$12 sps:$4 sm:$0xff]   ;;  %v391_v29 = vld [vmem:[%s361_s11] sm:$0xff]  ;;  %v1915_v33 = vld [vmem:[%s2487_s5 + $0x30] ss:$12 sps:$4 sm:$0xff]   ;;  %v2261_v51 = vsub.s32 1, %v2252_v48 }
  0x16   : > { %505 = vmatpush1.bf16.msra.mxu0 %v1880_v7  ;;  %551 = vperm.xlu0 %1869, %v390_v11   ;;  %v1912_v32 = vld [vmem:[%s2487_s5 + $0x34] ss:$12 sps:$4 sm:$0xff]   ;;  %v392_v34 = vpack.c.bf16 %v391_v29, %v391_v29  ;;  %v1914_v35 = vld [vmem:[%s2487_s5 + $0x98] ss:$12 sps:$4 sm:$0xff]   ;;  %v1916_v36 = vld [vmem:[%s2487_s5 + $0x1c] ss:$12 sps:$4 sm:$0xff]  }
  0x17   : > { %506 = vmatprep.subr.bf16.mxu0 %v1881_v8  ;;  %773 = vmatpush1.bf16.msra.mxu1 %v1901_v16  ;;  %v1918_v37 = vld [vmem:[%s2487_s5 + $0x80] ss:$12 sps:$4 sm:$0xff]   ;;  %v1919_v38 = vld [vmem:[%s2487_s5 + $0x18] ss:$12 sps:$4 sm:$0xff]   ;;  %v1922_v40 = vld [vmem:[%s2487_s5 + $0x68] ss:$12 sps:$4 sm:$0xff]  }
  0x18   : > { %774 = vmatprep.subr.bf16.mxu1 %v1902_v19  ;;  %v1920_v39 = vld [vmem:[%s2487_s5 + $0x4] ss:$12 sps:$4 sm:$0xff]   ;;  %v1923_v41 = vld [vmem:[%s2487_s5] ss:$12 sps:$4 sm:$0xff]   ;;  %v1927_v43 = vld [vmem:[%s2486_s4 + $0x74] ss:$8 sps:$4 sm:$0xff]  }
  0x19   : > { %v1924_v42 = vld [vmem:[%s2487_s5 + $0x50] ss:$12 sps:$4 sm:$0xff]   ;;  %v1928_v44 = vld [vmem:[%s2487_s5 + $0x38] ss:$12 sps:$4 sm:$0xff]   ;;  %v1932_v45 = vld [vmem:[%s2487_s5 + $0x20] ss:$12 sps:$4 sm:$0xff]  }
  0x1a   : > { %507 = vmatpush1.bf16.msra.mxu0 %v1883_v9  ;;  %v1936_v46 = vld [vmem:[%s2487_s5 + $0x8] ss:$12 sps:$4 sm:$0xff]   ;;  %v383_v50 = vld [vmem:[%s2488_s6] ss:$4 sm:$0x3]  ;;  %vm586_vm0 = vcmask 1040384  }
  0x1b   : > { %508 = vmatprep.subr.bf16.mxu0 %v1884_v10  ;;  %775 = vmatpush1.bf16.msra.mxu1 %v1904_v22  ;;  %v413_v53 = vrot.slane %v383_v50, %v2255_v49  ;;  %v417_v54 = vrot.slane %v383_v50, %v2261_v51  ;;  %v1925_v10 = vld [vmem:[%s2486_s4 + $0x70] ss:$8 sps:$4 sm:$0xff]   ;;  %vm588_vm1 = vcmask 1041408   ;;  %vm590_vm2 = vcmask 1042432   ;;  %s2493_s27 = smov (!%p367_p4, %s366_s27), 9  ;;  %s1785_s13 = sshll.u32 %s2125_s19, 4 }
  0x1c   : > { %776 = vmatprep.subr.bf16.mxu1 %v1905_v23  ;;  %v1943_v50 = vld [vmem:[%s2486_s4 + $0x20] ss:$8 sps:$4 sm:$0xff]   ;;  %s1689_s24 = sshll.u32 %s2493_s27, 3  ;;  %s376_s16 = scalar_lea.vmem %s2490_s8, %s1785_s13  ;;  %vm1539_vm3 = vcmask 130048   ;;  %vm1541_vm4 = vcmask 261120   ;;  %vm1349_vm5 = vcmask 269312  }
  0x1d   : > { %s370_s29 = scalar_lea.vmem %s2484_s2, %s1689_s24  ;;  %vm1548_vm6 = vcmask 277504   ;;  %s1786_s21 = sshll.u32 %s2125_s19, 5  ;;  %vm2048_vm7 = vmmov 0   ;;  %vm1326_vm8 = vcmask 130112   ;;  %vm1333_vm9 = vcmask 195712  }
  0x1e   : > { %509 = vmatpush1.bf16.msra.mxu0 %v1886_v15  ;;  %v1931_v15 = vld [vmem:[%s2486_s4 + $0x64] ss:$8 sps:$4 sm:$0xff]   ;;  %s2361_s25 = scalar_lea.vmem %s2491_s9, %s1786_s21  ;;  %vm1340_vm10 = vcmask 261312   ;;  %vm1347_vm11 = vcmask 326912  }
  0x1f   : > { %510 = vmatprep.subr.bf16.mxu0 %v1887_v17  ;;  %777 = vmatpush1.bf16.msra.mxu1 %v1907_v25  ;;  %v1935_v25 = vld [vmem:[%s2486_s4 + $0x54] ss:$8 sps:$4 sm:$0xff]  }
  0x20   : > { %778 = vmatprep.subr.bf16.mxu1 %v1908_v27 }
  0x22   : > { %511 = vmatpush1.bf16.msra.mxu0 %v1889_v20 }
  0x23   : > { %512 = vmatprep.subr.bf16.mxu0 %v1890_v21  ;;  %779 = vmatpush1.bf16.msra.mxu1 %v1911_v30  ;;  %v1929_v21 = vld [vmem:[%s2486_s4 + $0x60] ss:$8 sps:$4 sm:$0xff]  }
  0x24   : > { %780 = vmatprep.subr.bf16.mxu1 %v1912_v32 }
  0x26   : > { %513 = vmatpush1.bf16.msra.mxu0 %v1892_v24 }
  0x27   : > { %514 = vmatprep.subr.bf16.mxu0 %v1893_v26  ;;  %781 = vmatpush1.bf16.msra.mxu1 %v1915_v33 }
  0x28   : > { %782 = vmatprep.subr.bf16.mxu1 %v1916_v36 }
  0x2a   : > { %515 = vmatpush1.bf16.msra.mxu0 %v1895_v28 }
  0x2b   : > { %1809 = vmatprep.subr.bf16.mxu0 %v1910_v31  ;;  %783 = vmatpush1.bf16.msra.mxu1 %v1919_v38  ;;  %v1937_v38 = vld [vmem:[%s2486_s4 + $0x40] ss:$8 sps:$4 sm:$0xff]  }
  0x2c   : > { %784 = vmatprep.subr.bf16.mxu1 %v1920_v39 }
  0x2d   : > { %533 = vmatmul.mubr.bf16.vlgmr.msra.gmra.mxu0 %v392_v34  ;;  %v1939_v34 = vld [vmem:[%s2486_s4 + $0x44] ss:$8 sps:$4 sm:$0xff]  }
  0x2e   : > { %1810 = vmatpush3.bf16.msra.mxu0 %v1910_v31  ;;  %v1933_v31 = vld [vmem:[%s2486_s4 + $0x50] ss:$8 sps:$4 sm:$0xff]  }
  0x2f   : > { %1811 = vmatprep.subr.bf16.mxu0 %v1914_v35  ;;  %785 = vmatpush1.bf16.msra.mxu1 %v1923_v41  ;;  %v1942_v41 = vld [vmem:[%s2486_s4 + $0x34] ss:$8 sps:$4 sm:$0xff]  }
  0x30   : > { %986 = vmatprep.subr.bf16.mxu1 %v1927_v43 }
  0x32   : > { %1812 = vmatpush3.bf16.msra.mxu0 %v1914_v35 }
  0x33   : > { %1813 = vmatprep.subr.bf16.mxu0 %v1918_v37 }
  0x36   : > { %1814 = vmatpush3.bf16.msra.mxu0 %v1918_v37 }
  0x37   : > { %1815 = vmatprep.subr.bf16.mxu0 %v1922_v40 }
  0x3a   : > { %1816 = vmatpush3.bf16.msra.mxu0 %v1922_v40 }
  0x3b   : > { %1817 = vmatprep.subr.bf16.mxu0 %v1924_v42 }
  0x3e   : > { %1818 = vmatpush3.bf16.msra.mxu0 %v1924_v42 }
  0x3f   : > { %1819 = vmatprep.subr.bf16.mxu0 %v1928_v44 }
  0x42   : > { %1820 = vmatpush3.bf16.msra.mxu0 %v1928_v44 }
  0x43   : > { %1821 = vmatprep.subr.bf16.mxu0 %v1932_v45 }
  0x46   : > { %1822 = vmatpush3.bf16.msra.mxu0 %v1932_v45  ;;  %v1940_v45 = vld [vmem:[%s2486_s4 + $0x30] ss:$8 sps:$4 sm:$0xff]  }
  0x47   : > { %1823 = vmatprep.subr.bf16.mxu0 %v1936_v46 }
  0x4a   : > { %1824 = vmatpush3.bf16.msra.mxu0 %v1936_v46  ;;  %v1945_v46 = vld [vmem:[%s2486_s4 + $0x24] ss:$8 sps:$4 sm:$0xff]  }
  0x8c   : > { %v546_v52 = vpop.permute.xlu0 %545  ;;  %v570_v57 = vpop.permute.xlu1 %569 }
  0x91   : > { %v552_v59 = vpop.permute.xlu0 %551 }
  0xed   : > { %v534_v55 = vpop.f32.mrf.mxu0 }
  0xee   : > { %v535_v56 = vadd.f32 %v534_v55, %v413_v53  ;;  %v1946_v53 = vld [vmem:[%s2486_s4 + $0x10] ss:$8 sps:$4 sm:$0xff]   ;;  %v1949_v55 = vld [vmem:[%s2486_s4] ss:$8 sps:$4 sm:$0xff]  }
  0xef   : > { %v536_v58 = vpop.f32.mrf.mxu0 }
  0xf0   : > { %v541_v60 = vmax.f32 %v535_v56, 0.0  ;;  %v537_v61 = vadd.f32 %v536_v58, %v417_v54  ;;  %v1951_v54 = vld [vmem:[%s2486_s4 + $0x4] ss:$8 sps:$4 sm:$0xff]  }
  0xf1   : > { %v538_v62 = vpop.f32.mrf.mxu0  ;;  %v871_v56 = vld [vmem:[%s370_s29] sm:$0xff] }
  0xf2   : > { %v542_v63 = vmax.f32 %v537_v61, 0.0  ;;  %v572_v0 = vmul.f32 %v570_v57, %v541_v60  ;;  %v554_v1 = vmul.f32 %v552_v59, %v541_v60  ;;  %v548_v3 = vmul.f32 %v546_v52, %v541_v60  ;;  %v874_v60 = vld [vmem:[%s370_s29 + $0x18] sm:$0xff]  ;;  %v875_v62 = vld [vmem:[%s370_s29 + $0x20] sm:$0xff] }
  0xf3   : > { %v539_v4 = vpop.f32.mrf.mxu0 }
  0xf4   : > { %v549_v5 = vmul.f32 %v546_v52, %v542_v63  ;;  %v573_v6 = vmul.f32 %v570_v57, %v542_v63  ;;  %v574_v7 = vrot.slane %v572_v0, 4  ;;  %v555_v8 = vmul.f32 %v552_v59, %v542_v63  ;;  %v1948_v52 = vld [vmem:[%s2486_s4 + $0x14] ss:$8 sps:$4 sm:$0xff]   ;;  %v872_v57 = vld [vmem:[%s370_s29 + $0x8] sm:$0xff] }
  0xf5   : > { %v556_v9 = vrot.slane %v554_v1, 4  ;;  %v876_v58 = vpack.c.bf16 %v872_v57, %v871_v56  ;;  %v873_v59 = vld [vmem:[%s370_s29 + $0x10] sm:$0xff]  ;;  %v878_v63 = vpack.c.bf16 %v875_v62, %v875_v62 }
  0xf6   : > { %v575_v11 = vadd.f32 %v574_v7, %v572_v0  ;;  %v580_v12 = vrot.slane %v573_v6, 4  ;;  %v562_v13 = vrot.slane %v555_v8, 4  ;;  %v592_v14 = vpack.c.bf16 %v549_v5, %v548_v3  ;;  %v1696_v0 = vld [vmem:[%s2488_s6 + $0x3] ss:$4 sm:$0x7] }
  0xf7   : > { %v557_v16 = vadd.f32 %v556_v9, %v554_v1  ;;  %v877_v61 = vpack.c.bf16 %v874_v60, %v873_v59  ;;  %v630_v1 = vrot.slane %v1696_v0, %v2255_v49  ;;  %v2335_v9 = vsub.s32 2, %v2252_v48 }
  0xf8   : > { %v576_v17 = vrot.slane %v575_v11, 2  ;;  %v581_v18 = vadd.f32 %v580_v12, %v573_v6  ;;  %v563_v19 = vadd.f32 %v562_v13, %v555_v8  ;;  %803 = vmatmul.mubr.bf16.vlgmr.msra.gmra.mxu1 %v592_v14  ;;  %1825 = vmatprep.mubr.bf16.mxu0 %v592_v14 }
  0xf9   : > { %v558_v20 = vrot.slane %v557_v16, 2  ;;  %987 = vmatpush1.bf16.msra.mxu1 %v1925_v10  ;;  %810 = vmatprep.mubr.bf16.mxu1 %v2044_v2  ;;  %v638_v10 = vrot.slane %v1696_v0, %v2335_v9 }
  0xfa   : > { %v577_v22 = vadd.f32 %v576_v17, %v575_v11  ;;  %v582_v23 = vrot.slane %v581_v18, 2  ;;  %v564_v24 = vrot.slane %v563_v19, 2  ;;  %988 = vmatprep.subr.bf16.mxu1 %v1931_v15 }
  0xfb   : > { %v559_v26 = vadd.f32 %v558_v20, %v557_v16 }
  0xfc   : > { %v583_v27 = vadd.f32 %v582_v23, %v581_v18  ;;  %v565_v28 = vadd.f32 %v564_v24, %v563_v19  ;;  %v578_v29 = vrot.slane %v577_v22, 1 }
  0xfd   : > { %v560_v30 = vrot.slane %v559_v26, 1  ;;  %989 = vmatpush1.bf16.msra.mxu1 %v1929_v21  ;;  %v1694_v21 = vld [vmem:[%s2488_s6 + $0x1] ss:$4 sm:$0x3] }
  0xfe   : > { %v584_v32 = vrot.slane %v583_v27, 1  ;;  %v566_v33 = vrot.slane %v565_v28, 1  ;;  %990 = vmatprep.subr.bf16.mxu1 %v1935_v25  ;;  %v579_v37 = vadd.f32 %v578_v29, %v577_v22  ;;  %v899_v22 = vrot.slane %v1694_v21, %v2255_v49 }
  0xff   : > { %v2285_v35 = vadd.f32 %v560_v30, %v559_v26 }
 0x100   : > { %v2287_v36 = vadd.f32 %v566_v33, %v565_v28  ;;  %v585_v39 = vadd.f32 %v584_v32, %v583_v27  ;;  %v2345_v28 = vld [vmem:[%s2488_s6 + $0x2] ss:$4 sm:$0x7] }
 0x101   : > { %991 = vmatpush1.bf16.msra.mxu1 %v1933_v31  ;;  %v1112_v33 = vrot.slane %v2345_v28, %v2255_v49 }
 0x102   : > { %992 = vmatprep.subr.bf16.mxu1 %v1939_v34  ;;  %v587_v40 = vsel %vm586_vm0, %v2285_v35, %v2287_v36 }
 0x103   : > { %v589_v42 = vsel %vm588_vm1, %v587_v40, %v579_v37 }
 0x104   : > { %v591_v43 = vsel %vm590_vm2, %v589_v42, %v585_v39 }
 0x105   : > { %993 = vmatpush1.bf16.msra.mxu1 %v1937_v38  ;;  %v593_v44 = vpack.c.bf16 %v591_v43, %v591_v43 }
 0x106   : > { %994 = vmatprep.subr.bf16.mxu1 %v1942_v41 }
 0x107   : > { %811 = vmatmul.mubr.bf16.gmra.mxu1 %v593_v44  ;;  %1826 = vmatmul.mubr.bf16.vlgmr.msra.gmra.mxu0 %v593_v44 }
 0x108   : > { %1018 = vmatprep.mubr.bf16.mxu1 %v2044_v2 }
 0x109   : > { %995 = vmatpush1.bf16.msra.mxu1 %v1940_v45 }
 0x10a   : > { %996 = vmatprep.subr.bf16.mxu1 %v1945_v46 }
 0x10d   : > { %997 = vmatpush1.bf16.msra.mxu1 %v1943_v50 }
 0x10e   : > { %998 = vmatprep.subr.bf16.mxu1 %v1948_v52 }
 0x111   : > { %999 = vmatpush1.bf16.msra.mxu1 %v1946_v53 }
 0x112   : > { %1000 = vmatprep.subr.bf16.mxu1 %v1951_v54  ;;  %v903_v54 = vrot.slane %v1694_v21, %v2261_v51 }
 0x115   : > { %1001 = vmatpush1.bf16.msra.mxu1 %v1949_v55 }
 0x118   : > { %1019 = vmatmul.mubr.bf16.vlgmr.msra.gmra.mxu1 %v876_v58 }
 0x119   : > { %1028 = vmatprep.mubr.bf16.mxu1 %v2044_v2 }
 0x120   : > { %1029 = vmatmul.mubr.bf16.gmra.mxu1 %v877_v61 }
 0x121   : > { %1038 = vmatprep.mubr.bf16.mxu1 %v2044_v2  ;;  %v634_v2 = vrot.slane %v1696_v0, %v2261_v51 }
 0x128   : > { %1039 = vmatmul.mubr.bf16.gmra.mxu1 %v878_v63 }
 0x1b8   : > { %v804_v3 = vpop.f32.mrf.mxu1 }
 0x1b9   : > { %v805_v4 = vadd.f32 %v804_v3, %v630_v1 }
 0x1ba   : > { %v806_v5 = vpop.f32.mrf.mxu1 }
 0x1bb   : > { %863 = vst [vmem:[%s376_s16] sm:$0xff] %v805_v4 }
 0x1bc   : > { %v807_v6 = vpop.f32.mrf.mxu1 }
 0x1be   : > { %v808_v7 = vpop.f32.mrf.mxu1 }
 0x1bf   : > { %v809_v8 = vadd.f32 %v808_v7, %v634_v2 }
 0x1c1   : > { %864 = vst [vmem:[%s376_s16 + $0x8] sm:$0xff] %v809_v8 }
 0x1c7   : > { %v812_v11 = vpop.f32.mrf.mxu1  ;;  %v1827_v12 = vpop.f32.mrf.mxu0 }
 0x1c8   : > { %v858_v13 = vadd.f32 %v1827_v12, %v638_v10 }
 0x1c9   : > { %v813_v14 = vpop.f32.mrf.mxu1  ;;  %v851_v15 = vpop.f32.mrf.mxu0 }
 0x1ca   : > { %v1737_v16 = vmul.f32 -1.442695, %v858_v13 }
 0x1cb   : > { %v814_v17 = vpop.f32.mrf.mxu1  ;;  %v1828_v18 = vpop.f32.mrf.mxu0 }
 0x1cc   : > { %1952 = vpow2.f32 %v1737_v16  ;;  %v1181_v17 = vrot.slane %v2345_v28, 1 }
 0x1cd   : > { %v815_v19 = vpop.f32.mrf.mxu1  ;;  %v853_v20 = vpop.f32.mrf.mxu0 }
 0x1ce   : > { %v1185_v19 = vrot.slane %v1181_v17, %v2255_v49 }
 0x1d8   : > { %v1020_v23 = vpop.f32.mrf.mxu1 }
 0x1d9   : > { %v1953_v24 = vpop.eup %1952  ;;  %v1021_v25 = vadd.f32 %v1020_v23, %v899_v22 }
 0x1da   : > { %v868_v26 = vadd.f32 1.0, %v1953_v24  ;;  %v1022_v27 = vpop.f32.mrf.mxu1 }
 0x1db   : > { %v1047_v29 = vmax.f32 %v1021_v25, 0.0  ;;  %v1023_v51 = vadd.f32 %v1022_v27, %v903_v54 }
 0x1dc   : > { %1954 = vrcp.f32 %v868_v26  ;;  %v1024_v30 = vpop.f32.mrf.mxu1 }
 0x1dd   : > { %v1025_v31 = vadd.f32 %v1024_v30, %v899_v22  ;;  %v1057_v32 = vmul.f32 %v1047_v29, %v2285_v35  ;;  %v1114_v41 = vmul.f32 %v1112_v33, %v1047_v29  ;;  %v1048_v12 = vmax.f32 %v1023_v51, 0.0 }
 0x1de   : > { %v1026_v34 = vpop.f32.mrf.mxu1 }
 0x1df   : > { %v1049_v37 = vmax.f32 %v1025_v31, 0.0  ;;  %1062 = vadd.xlane.f32.xlu1 %v1057_v32  ;;  %v1027_v13 = vadd.f32 %v1026_v34, %v903_v54  ;;  %v1130_v16 = vmul.f32 %v1048_v12, %v2287_v36  ;;  %v1187_v21 = vmul.f32 %v1185_v19, %v1048_v12 }
 0x1e0   : > { %v1030_v38 = vpop.f32.mrf.mxu1 }
 0x1e1   : > { %v1031_v39 = vadd.f32 %v1030_v38, %v899_v22  ;;  %v1058_v40 = vmul.f32 %v1049_v37, %v2285_v35  ;;  %v1115_v46 = vmul.f32 %v1112_v33, %v1049_v37  ;;  %v1050_v15 = vmax.f32 %v1027_v13, 0.0 }
 0x1e2   : > { %v1032_v42 = vpop.f32.mrf.mxu1 }
 0x1e3   : > { %v1051_v43 = vmax.f32 %v1031_v39, 0.0  ;;  %1064 = vadd.xlane.f32.xlu0 %v1058_v40  ;;  %1119 = vadd.xlane.f32.xlu1 %v1114_v41  ;;  %v1131_v18 = vmul.f32 %v1050_v15, %v2287_v36  ;;  %v1033_v20 = vadd.f32 %v1032_v42, %v903_v54  ;;  %v1188_v24 = vmul.f32 %v1185_v19, %v1050_v15  ;;  %v1303_v40 = vld [vmem:[%s2489_s7 + $0x20] sm:$0x1]  ;;  %v1302_v41 = vld [vmem:[%s2489_s7 + $0x18] sm:$0xff]  ;;  %v1300_v42 = vld [vmem:[%s2489_s7 + $0x8] sm:$0xff] }
 0x1e4   : > { %v1034_v44 = vpop.f32.mrf.mxu1  ;;  %v2047_v39 = vmov 0.0  }
 0x1e5   : > { %v1035_v45 = vadd.f32 %v1034_v44, %v899_v22  ;;  %v1059_v50 = vmul.f32 %v1051_v43, %v2285_v35  ;;  %v1116_v58 = vmul.f32 %v1112_v33, %v1051_v43  ;;  %1829 = vmatprep.subr.mxu0 %v2047_v39  ;;  %v1299_v43 = vld [vmem:[%s2489_s7] sm:$0xff]  ;;  %1839 = vmatprep.mubr.msk.f32.mxu0 %vm2048_vm7, %v2047_v39 }
 0x1e6   : > { %v1036_v52 = vpop.f32.mrf.mxu1  ;;  %1830 = vmatpush3.msk.msra.mxu0 %vm586_vm0, %v1303_v40 }
 0x1e7   : > { %v1053_v53 = vmax.f32 %v1035_v45, 0.0  ;;  %1121 = vadd.xlane.f32.xlu0 %v1115_v46  ;;  %1066 = vadd.xlane.f32.xlu1 %v1059_v50  ;;  %v1037_v23 = vadd.f32 %v1036_v52, %v903_v54 }
 0x1e8   : > { %v1040_v55 = vpop.f32.mrf.mxu1  ;;  %1831 = vmatprep.subr.mxu0 %v2047_v39 }
 0x1e9   : > { %v1955_v56 = vpop.eup %1954  ;;  %v1041_v57 = vadd.f32 %v1040_v55, %v899_v22  ;;  %v1060_v59 = vmul.f32 %v1053_v53, %v2285_v35  ;;  %v1117_v4 = vmul.f32 %v1112_v33, %v1053_v53  ;;  %v1052_v22 = vmax.f32 %v1033_v20, 0.0  ;;  %1832 = vmatpush3.msra.mxu0 %v1302_v41 }
 0x1ea   : > { %v1042_v60 = vpop.f32.mrf.mxu1  ;;  %v1533_v61 = vrot.slane %v1955_v56, 1  ;;  %v1535_v62 = vrot.slane %v1955_v56, 2  ;;  %v1537_v1 = vrot.slane %v1955_v56, 3  ;;  %v1054_v25 = vmax.f32 %v1037_v23, 0.0  ;;  %1833 = vmatprep.subr.mxu0 %v2047_v39 }
 0x1eb   : > { %v1055_v63 = vmax.f32 %v1041_v57, 0.0  ;;  %1123 = vadd.xlane.f32.xlu0 %v1116_v58  ;;  %1068 = vadd.xlane.f32.xlu1 %v1060_v59  ;;  %v1189_v26 = vmul.f32 %v1185_v19, %v1052_v22  ;;  %v1043_v27 = vadd.f32 %v1042_v60, %v903_v54  ;;  %v1132_v38 = vmul.f32 %v1052_v22, %v2287_v36 }
 0x1ec   : > { %v1044_v0 = vpop.f32.mrf.mxu1  ;;  %v1540_v3 = vsel %vm1539_vm3, %v1955_v56, %v1533_v61  ;;  %v1133_v29 = vmul.f32 %v1054_v25, %v2287_v36  ;;  %v1190_v31 = vmul.f32 %v1185_v19, %v1054_v25 }
 0x1ed   : > { %v1061_v5 = vmul.f32 %v1055_v63, %v2285_v35  ;;  %v1542_v2 = vsel %vm1541_vm4, %v1540_v3, %v1535_v62  ;;  %v1118_v7 = vmul.f32 %v1112_v33, %v1055_v63  ;;  %v1056_v30 = vmax.f32 %v1043_v27, 0.0 }
 0x1ee   : > { %v1045_v6 = vpop.f32.mrf.mxu1  ;;  %v1543_v8 = vsel %vm1349_vm5, %v1542_v2, %v1537_v1 }
 0x1ef   : > { %1125 = vadd.xlane.f32.xlu0 %v1117_v4  ;;  %v1070_v10 = vsel %vm586_vm0, %v1061_v5, 0.0  ;;  %v1549_v11 = vsel %vm1548_vm6, %v1543_v8, 0.0  ;;  %v1127_v14 = vsel %vm586_vm0, %v1118_v7, 0.0  ;;  %v1134_v32 = vmul.f32 %v1056_v30, %v2287_v36  ;;  %v1301_v36 = vld [vmem:[%s2489_s7 + $0x10] sm:$0xff] }
 0x1f0   : > { %1071 = vadd.xlane.f32.xlu1 %v1070_v10  ;;  %v1565_v35 = vrot.slane %v1549_v11, %v2255_v49  ;;  %v1191_v34 = vmul.f32 %v1185_v19, %v1056_v30  ;;  %1834 = vmatpush3.msra.mxu0 %v1301_v36 }
 0x1f1   : > { %v1143_v33 = vsel %vm586_vm0, %v1134_v32, 0.0  ;;  %1835 = vmatprep.subr.mxu0 %v2047_v39 }
 0x1f2   : > { %1569 = vst [vmem:[%s2361_s25 + $0x18] sm:$0xff] %v1565_v35  ;;  %v1200_v37 = vsel %vm586_vm0, %v1191_v34, 0.0  ;;  %1836 = vmatpush3.msra.mxu0 %v1300_v42 }
 0x1f3   : > { %1128 = vadd.xlane.f32.xlu0 %v1127_v14  ;;  %1837 = vmatprep.subr.mxu0 %v2047_v39 }
 0x1f4   : > { %1838 = vmatpush3.msra.mxu0 %v1299_v43 }
 0x1f5   : > { %1842 = vmatprep.subr.mxu0 %v2047_v39 }
 0x1f7   : > { %1135 = vadd.xlane.f32.xlu0 %v1130_v16 }
 0x1fb   : > { %1137 = vadd.xlane.f32.xlu0 %v1131_v18 }
 0x1ff   : > { %1192 = vadd.xlane.f32.xlu0 %v1187_v21 }
 0x201   : > { %1204 = vperm.xlu1 %1871, %v2345_v28  }
 0x203   : > { %1194 = vadd.xlane.f32.xlu0 %v1188_v24 }
 0x207   : > { %1196 = vadd.xlane.f32.xlu0 %v1189_v26 }
 0x20b   : > { %1141 = vadd.xlane.f32.xlu0 %v1133_v29 }
 0x20f   : > { %1198 = vadd.xlane.f32.xlu0 %v1190_v31 }
 0x213   : > { %1144 = vadd.xlane.f32.xlu0 %v1143_v33 }
 0x217   : > { %1201 = vadd.xlane.f32.xlu0 %v1200_v37 }
 0x225   : > { %1139 = vadd.xlane.f32.xlu1 %v1132_v38 }
 0x22d   : > { %1247 = vperm.xlu0 %1869, %v2345_v28  }
 0x268   : > { %v1063_v44 = vpop.xlane.xlu1 %1062 }
 0x269   : > { %v1754_v54 = vmul.f32 -0.088388346, %v1063_v44  ;;  %v1316_v44 = vand.u32 127, %v410_v47 }
 0x26b   : > { %v1083_v58 = vmul.f32 1.442695, %v1754_v54 }
 0x26c   : > { %v1065_v45 = vpop.xlane.xlu0 %1064  ;;  %v1120_v46 = vpop.xlane.xlu1 %1119 }
 0x26d   : > { %v1755_v55 = vmul.f32 -0.088388346, %v1065_v45  ;;  %1956 = vpow2.f32 %v1083_v58 }
 0x26f   : > { %v1085_v61 = vmul.f32 1.442695, %v1755_v55 }
 0x270   : > { %v1122_v50 = vpop.xlane.xlu0 %1121  ;;  %v1067_v52 = vpop.xlane.xlu1 %1066 }
 0x271   : > { %v1756_v56 = vmul.f32 -0.088388346, %v1067_v52  ;;  %1958 = vpow2.f32 %v1085_v61 }
 0x273   : > { %v1087_v62 = vmul.f32 1.442695, %v1756_v56  ;;  %v2410_v56 = vsub.s32 %v1316_v44, %v2252_v48 }
 0x274   : > { %v1124_v28 = vpop.xlane.xlu0 %1123  ;;  %v1069_v53 = vpop.xlane.xlu1 %1068 }
 0x275   : > { %v1757_v59 = vmul.f32 -0.088388346, %v1069_v53  ;;  %1960 = vpow2.f32 %v1087_v62  ;;  %v1335_v53 = vadd.s32 4294967272, %v1316_v44 }
 0x277   : > { %v1089_v0 = vmul.f32 1.442695, %v1757_v59 }
 0x278   : > { %v1126_v57 = vpop.xlane.xlu0 %1125 }
 0x279   : > { %v1072_v60 = vpop.xlane.xlu1 %1071  ;;  %1962 = vpow2.f32 %v1089_v0 }
 0x27a   : > { %v1758_v1 = vmul.f32 -0.088388346, %v1072_v60  ;;  %v1957_v17 = vpop.eup %1956 }
 0x27b   : > { %v1093_v21 = vadd.f32 1.0, %v1957_v17 }
 0x27c   : > { %v1129_v63 = vpop.xlane.xlu0 %1128  ;;  %v1091_v8 = vmul.f32 1.442695, %v1758_v1  ;;  %v2419_v1 = vsub.s32 %v1335_v53, %v2252_v48 }
 0x27d   : > { %v1205_v3 = vpop.permute.xlu1 %1204 }
 0x27e   : > { %v1210_v51 = vrot.slane %v1205_v3, %v2335_v9  ;;  %v1959_v18 = vpop.eup %1958 }
 0x27f   : > { %v1094_v23 = vadd.f32 1.0, %v1959_v18 }
 0x280   : > { %v1211_v4 = vadd.f32 %v1210_v51, %v1120_v46  ;;  %v1212_v5 = vadd.f32 %v1210_v51, %v1122_v50  ;;  %v1213_v2 = vadd.f32 %v1210_v51, %v1124_v28  ;;  %v1214_v6 = vadd.f32 %v1210_v51, %v1126_v57  ;;  %v1136_v7 = vpop.xlane.xlu0 %1135 }
 0x281   : > { %v1215_v10 = vadd.f32 %v1210_v51, %v1129_v63  ;;  %v1321_v50 = vadd.s32 4294967288, %v1316_v44  ;;  %v1328_v28 = vadd.s32 4294967280, %v1316_v44  ;;  %v1759_v55 = vmul.f32 -0.088388346, %v1136_v7 }
 0x282   : > { %v1764_v11 = vmul.f32 -1.442695, %v1211_v4  ;;  %v1765_v12 = vmul.f32 -1.442695, %v1212_v5  ;;  %v1766_v13 = vmul.f32 -1.442695, %v1213_v2  ;;  %v1961_v19 = vpop.eup %1960 }
 0x283   : > { %v1767_v35 = vmul.f32 -1.442695, %v1214_v6  ;;  %v1768_v15 = vmul.f32 -1.442695, %v1215_v10  ;;  %v1095_v24 = vadd.f32 1.0, %v1961_v19  ;;  %v1342_v57 = vadd.s32 4294967264, %v1316_v44 }
 0x284   : > { %1964 = vpow2.f32 %v1764_v11  ;;  %v1138_v14 = vpop.xlane.xlu0 %1137  ;;  %v2413_v63 = vsub.s32 %v1321_v50, %v2252_v48  ;;  %v2416_v0 = vsub.s32 %v1328_v28, %v2252_v48  ;;  %v1156_v51 = vmul.f32 1.442695, %v1759_v55 }
 0x285   : > { %1966 = vpow2.f32 %v1091_v8  ;;  %v1760_v59 = vmul.f32 -0.088388346, %v1138_v14  ;;  %v2423_v6 = vsub.s32 %v1342_v57, %v2252_v48 }
 0x286   : > { %1968 = vpow2.f32 %v1765_v12  ;;  %v1963_v22 = vpop.eup %1962 }
 0x287   : > { %1970 = vpow2.f32 %v1766_v13  ;;  %v1096_v27 = vadd.f32 1.0, %v1963_v22  ;;  %v1158_v8 = vmul.f32 1.442695, %v1760_v59 }
 0x288   : > { %1972 = vpow2.f32 %v1767_v35  ;;  %v2402_v16 = vpop.xlane.xlu0 %1192 }
 0x289   : > { %1974 = vpow2.f32 %v1768_v15 }
 0x28a   : > { %1976 = vrcp.f32 %v1093_v21 }
 0x28b   : > { %1978 = vrcp.f32 %v1094_v23 }
 0x28c   : > { %v2404_v20 = vpop.xlane.xlu0 %1194  ;;  %1980 = vrcp.f32 %v1095_v24 }
 0x290   : > { %v2406_v25 = vpop.xlane.xlu0 %1196 }
 0x291   : > { %v1965_v26 = vpop.eup %1964 }
 0x292   : > { %v1967_v29 = vpop.eup %1966  ;;  %v1231_v30 = vadd.f32 1.0, %v1965_v26 }
 0x293   : > { %v1969_v31 = vpop.eup %1968  ;;  %v1097_v38 = vadd.f32 1.0, %v1967_v29 }
 0x294   : > { %v1971_v32 = vpop.eup %1970  ;;  %v1232_v33 = vadd.f32 1.0, %v1969_v31  ;;  %1982 = vrcp.f32 %v1231_v30  ;;  %v1142_v34 = vpop.xlane.xlu0 %1141 }
 0x295   : > { %v1973_v37 = vpop.eup %1972  ;;  %1984 = vrcp.f32 %v1096_v27  ;;  %v1233_v40 = vadd.f32 1.0, %v1971_v32  ;;  %v1762_v61 = vmul.f32 -0.088388346, %v1142_v34 }
 0x296   : > { %v1234_v41 = vadd.f32 1.0, %v1973_v37  ;;  %1986 = vrcp.f32 %v1232_v33  ;;  %v1975_v36 = vpop.eup %1974  ;;  %v1778_v33 = vld [vmem:[%s2489_s7 + $0x48] sm:$0x1] }
 0x297   : > { %1988 = vrcp.f32 %v1233_v40  ;;  %v1235_v42 = vadd.f32 1.0, %v1975_v36  ;;  %v1977_v45 = vpop.eup %1976  ;;  %v1162_v13 = vmul.f32 1.442695, %v1762_v61 }
 0x298   : > { %1990 = vrcp.f32 %v1234_v41  ;;  %v1199_v43 = vpop.xlane.xlu0 %1198  ;;  %v1979_v52 = vpop.eup %1978 }
 0x299   : > { %1992 = vrcp.f32 %v1097_v38  ;;  %v1981_v54 = vpop.eup %1980 }
 0x29a   : > { %1994 = vrcp.f32 %v1235_v42 }
 0x29b   : > { %1996 = vpow2.f32 %v1156_v51 }
 0x29c   : > { %v1145_v46 = vpop.xlane.xlu0 %1144  ;;  %1998 = vpow2.f32 %v1158_v8 }
 0x29d   : > { %v1763_v10 = vmul.f32 -0.088388346, %v1145_v46  ;;  %2000 = vpow2.f32 %v1162_v13 }
 0x29f   : > { %v1164_v22 = vmul.f32 1.442695, %v1763_v10 }
 0x2a0   : > { %v1202_v4 = vpop.xlane.xlu0 %1201 }
 0x2a1   : > { %v1983_v58 = vpop.eup %1982  ;;  %2002 = vpow2.f32 %v1164_v22 }
 0x2a2   : > { %v1985_v60 = vpop.eup %1984  ;;  %v1289_v62 = vmul.f32 %v1983_v58, %v1977_v45 }
 0x2a3   : > { %v1987_v47 = vpop.eup %1986 }
 0x2a4   : > { %v1989_v3 = vpop.eup %1988  ;;  %v1290_v5 = vmul.f32 %v1987_v47, %v1979_v52  ;;  %v1320_v2 = vrot.slane %v1289_v62, %v2410_v56 }
 0x2a5   : > { %v1991_v7 = vpop.eup %1990  ;;  %v1291_v11 = vmul.f32 %v1989_v3, %v1981_v54 }
 0x2a6   : > { %v1993_v12 = vpop.eup %1992  ;;  %v1292_v35 = vmul.f32 %v1991_v7, %v1985_v60  ;;  %v1325_v14 = vrot.slane %v1290_v5, %v2413_v63 }
 0x2a7   : > { %v1995_v15 = vpop.eup %1994  ;;  %v1332_v17 = vrot.slane %v1291_v11, %v2416_v0 }
 0x2a8   : > { %v1248_v18 = vpop.permute.xlu0 %1247  ;;  %v1293_v48 = vmul.f32 %v1995_v15, %v1993_v12  ;;  %v1327_v19 = vsel %vm1326_vm8, %v1325_v14, %v1320_v2  ;;  %v1339_v21 = vrot.slane %v1292_v35, %v2419_v1  ;;  %v1997_v46 = vpop.eup %1996 }
 0x2a9   : > { %v1253_v23 = vrot.slane %v1248_v18, %v2335_v9  ;;  %v1334_v24 = vsel %vm1333_vm9, %v1332_v17, %v1327_v19  ;;  %v1999_v50 = vpop.eup %1998  ;;  %v1166_v28 = vadd.f32 1.0, %v1997_v46 }
 0x2aa   : > { %v1341_v26 = vsel %vm1340_vm10, %v1339_v21, %v1334_v24  ;;  %v1346_v27 = vrot.slane %v1293_v48, %v2423_v6  ;;  %v2001_v52 = vpop.eup %2000  ;;  %v1167_v53 = vadd.f32 1.0, %v1999_v50 }
 0x2ab   : > { %v1254_v29 = vadd.f32 %v1253_v23, %v2402_v16  ;;  %v1255_v30 = vadd.f32 %v1253_v23, %v2404_v20  ;;  %v1256_v31 = vadd.f32 %v1253_v23, %v2406_v25  ;;  %v1257_v32 = vadd.f32 %v1253_v23, %v1199_v43  ;;  %v1777_v16 = vld [vmem:[%s2489_s7 + $0x40] sm:$0xff]  ;;  %v1776_v43 = vld [vmem:[%s2489_s7 + $0x38] sm:$0xff] }
 0x2ac   : > { %v1258_v34 = vadd.f32 %v1253_v23, %v1202_v4  ;;  %v1348_v9 = vsel %vm1347_vm11, %v1346_v27, %v1341_v26  ;;  %v1169_v55 = vadd.f32 1.0, %v2001_v52 }
 0x2ad   : > { %v1769_v37 = vmul.f32 -1.442695, %v1254_v29  ;;  %v1770_v38 = vmul.f32 -1.442695, %v1255_v30  ;;  %1840 = vmatmul.mubr.msk.f32.vlgmr.msra.gmra.mxu0 %vm1349_vm5, %v1348_v9  ;;  %v1771_v20 = vmul.f32 -1.442695, %v1256_v31 }
 0x2ae   : > { %v1547_v25 = vsel %vm1349_vm5, %v1348_v9, 0.0  ;;  %v1140_v40 = vpop.xlane.xlu1 %1139  ;;  %1843 = vmatpush3.msk.msra.mxu0 %vm586_vm0, %v1778_v33  ;;  %1852 = vmatprep.mubr.msk.f32.mxu0 %vm2048_vm7, %v2047_v39  ;;  %v1772_v41 = vmul.f32 -1.442695, %v1257_v32  ;;  %v1773_v44 = vmul.f32 -1.442695, %v1258_v34  ;;  %v2003_v54 = vpop.eup %2002 }
 0x2af   : > { %2004 = vpow2.f32 %v1769_v37  ;;  %v1561_v36 = vrot.slane %v1547_v25, %v2255_v49  ;;  %v1761_v42 = vmul.f32 -0.088388346, %v1140_v40  ;;  %1844 = vmatprep.subr.mxu0 %v2047_v39  ;;  %v1170_v59 = vadd.f32 1.0, %v2003_v54 }
 0x2b0   : > { %2006 = vpow2.f32 %v1770_v38  ;;  %1845 = vmatpush3.msra.mxu0 %v1777_v16 }
 0x2b1   : > { %v1160_v45 = vmul.f32 1.442695, %v1761_v42  ;;  %1846 = vmatprep.subr.mxu0 %v2047_v39  ;;  %1568 = vst [vmem:[%s2361_s25 + $0x10] sm:$0xff] %v1561_v36  ;;  %2008 = vpow2.f32 %v1771_v20 }
 0x2b2   : > { %1847 = vmatpush3.msra.mxu0 %v1776_v43  ;;  %2010 = vpow2.f32 %v1772_v41 }
 0x2b3   : > { %1848 = vmatprep.subr.mxu0 %v2047_v39  ;;  %2012 = vpow2.f32 %v1773_v44 }
 0x2b4   : > { %2014 = vpow2.f32 %v1160_v45 }
 0x2b5   : > { %2016 = vrcp.f32 %v1166_v28 }
 0x2b6   : > { %2018 = vrcp.f32 %v1167_v53 }
 0x2b7   : > { %2020 = vrcp.f32 %v1169_v55 }
 0x2bc   : > { %v2005_v57 = vpop.eup %2004 }
 0x2bd   : > { %v2007_v58 = vpop.eup %2006  ;;  %v1274_v60 = vadd.f32 1.0, %v2005_v57 }
 0x2be   : > { %v1275_v61 = vadd.f32 1.0, %v2007_v58  ;;  %v2009_v62 = vpop.eup %2008 }
 0x2bf   : > { %2022 = vrcp.f32 %v1274_v60  ;;  %v2011_v47 = vpop.eup %2010  ;;  %v1276_v3 = vadd.f32 1.0, %v2009_v62 }
 0x2c0   : > { %2024 = vrcp.f32 %v1275_v61  ;;  %v2013_v51 = vpop.eup %2012  ;;  %v1277_v4 = vadd.f32 1.0, %v2011_v47 }
 0x2c1   : > { %2026 = vrcp.f32 %v1170_v59  ;;  %v2015_v5 = vpop.eup %2014  ;;  %v1278_v2 = vadd.f32 1.0, %v2013_v51 }
 0x2c2   : > { %2028 = vrcp.f32 %v1276_v3  ;;  %v1168_v7 = vadd.f32 1.0, %v2015_v5  ;;  %v2017_v8 = vpop.eup %2016 }
 0x2c3   : > { %2030 = vrcp.f32 %v1277_v4  ;;  %v2019_v10 = vpop.eup %2018 }
 0x2c4   : > { %2032 = vrcp.f32 %v1278_v2  ;;  %v2021_v11 = vpop.eup %2020 }
 0x2c5   : > { %2034 = vrcp.f32 %v1168_v7 }
 0x2cc   : > { %v2023_v12 = vpop.eup %2022 }
 0x2cd   : > { %v2025_v13 = vpop.eup %2024  ;;  %v1294_v14 = vmul.f32 %v2023_v12, %v2017_v8 }
 0x2ce   : > { %v2027_v35 = vpop.eup %2026  ;;  %v1295_v15 = vmul.f32 %v2025_v13, %v2019_v10 }
 0x2cf   : > { %v2029_v17 = vpop.eup %2028  ;;  %v1433_v22 = vrot.slane %v1294_v14, %v2410_v56 }
 0x2d0   : > { %v2031_v18 = vpop.eup %2030  ;;  %v1437_v23 = vrot.slane %v1295_v15, %v2413_v63 }
 0x2d1   : > { %v2033_v48 = vpop.eup %2032  ;;  %v1297_v21 = vmul.f32 %v2031_v18, %v2021_v11 }
 0x2d2   : > { %v2035_v19 = vpop.eup %2034  ;;  %v1298_v26 = vmul.f32 %v2033_v48, %v2027_v35  ;;  %v1438_v29 = vsel %vm1326_vm8, %v1437_v23, %v1433_v22 }
 0x2d3   : > { %v1296_v24 = vmul.f32 %v2035_v19, %v2029_v17  ;;  %v1447_v30 = vrot.slane %v1297_v21, %v2419_v1  ;;  %v1774_v1 = vld [vmem:[%s2489_s7 + $0x28] sm:$0xff] }
 0x2d4   : > { %v1452_v32 = vrot.slane %v1298_v26, %v2423_v6 }
 0x2d5   : > { %v1442_v27 = vrot.slane %v1296_v24, %v2416_v0  ;;  %v1775_v0 = vld [vmem:[%s2489_s7 + $0x30] sm:$0xff] }
 0x2d6   : > { %1849 = vmatpush3.msra.mxu0 %v1775_v0 }
 0x2d7   : > { %v1443_v31 = vsel %vm1333_vm9, %v1442_v27, %v1438_v29  ;;  %1850 = vmatprep.subr.mxu0 %v2047_v39 }
 0x2d8   : > { %v1448_v33 = vsel %vm1340_vm10, %v1447_v30, %v1443_v31  ;;  %1851 = vmatpush3.msra.mxu0 %v1774_v1 }
 0x2d9   : > { %v1453_v34 = vsel %vm1347_vm11, %v1452_v32, %v1448_v33 }
 0x2da   : > { %v1545_v56 = vsel %vm1349_vm5, %v1453_v34, 0.0 }
 0x2db   : > { %v1557_v63 = vrot.slane %v1545_v56, %v2255_v49 }
 0x2dd   : > { %1567 = vst [vmem:[%s2361_s25 + $0x8] sm:$0xff] %v1557_v63 }
 0x36d   : > { %v1421_v6 = vpop.f32.mrf.mxu0 }
 0x36e   : > { %v1455_v9 = vmul.f32 %v1453_v34, %v1421_v6 }
 0x36f   : > { %v1841_v37 = vpop.f32.mrf.mxu0 }
 0x370   : > { %1853 = vmatmul.mubr.msk.f32.vlgmr.msra.gmra.mxu0 %vm1349_vm5, %v1455_v9 }
 0x430   : > { %v1528_v38 = vpop.f32.mrf.mxu0 }
 0x431   : > { %v1544_v16 = vsel %vm1349_vm5, %v1528_v38, 0.0 }
 0x432   : > { %v1553_v20 = vrot.slane %v1544_v16, %v2255_v49  ;;  %v1854_v25 = vpop.f32.mrf.mxu0 }
 0x434   : > { %1566 = vst [vmem:[%s2361_s25] sm:$0xff] %v1553_v20 }
 0x435 PF: > { %s20_s30 = sadd.s32 1, %s2042_s30  }
 0x436   : > { %p17_p5 = scmp.ge.s32.totalorder %s20_s30, 4  }
 0x438   :  { %19 = sbr.rel (!%p17_p5) target bundleno = 1 (0x1), region = 104 }

</bundles_post_ra>
